<compile_context>
chip_gen: v6e
topology: v6e:2x2x1
jax: 0.10.0
libtpu: 0.0.40
codegen_flags: <defaults>
</compile_context>

<pallas_src>
import math
from functools import partial

import jax
import jax.numpy as jnp
from jax.experimental import pallas as pl
from jax.experimental.pallas import tpu as pltpu


_NEG_INF = -1e30  # large finite negative: safe even if a row is fully masked


def _pick_tile(dim, cap, align):
    """Largest tile <= cap that is the full dim or an align-multiple divisor of dim."""
    if dim <= cap:
        return dim
    t = (cap // align) * align
    while t >= align:
        if dim % t == 0:
            return t
        t -= align
    return dim  # fallback: single block (only for awkward dims)


# ---------------------------------------------------------------------------
# Tiled linear (matmul, optional bias), K-reduction grid with f32 accumulator
# ---------------------------------------------------------------------------
def _linear_kernel(*refs, has_bias):
    if has_bias:
        x_ref, w_ref, b_ref, o_ref, acc_ref = refs
    else:
        x_ref, w_ref, o_ref, acc_ref = refs
        b_ref = None

    @pl.when(pl.program_id(2) == 0)
    def _init():
        acc_ref[...] = jnp.zeros_like(acc_ref)

    acc_ref[...] += jnp.dot(x_ref[...], w_ref[...],
                            preferred_element_type=jnp.float32)

    @pl.when(pl.program_id(2) == pl.num_programs(2) - 1)
    def _finalize():
        acc = acc_ref[...]
        if b_ref is not None:
            acc = acc + b_ref[...].astype(jnp.float32)
        o_ref[...] = acc.astype(o_ref.dtype)


def pallas_linear(x2d, w, b=None, *, tm_cap=256, tn_cap=256, tk_cap=512,
                  compute_dtype=jnp.float32):
    """out = x2d @ w (+ b).  x2d: (M,K), w: (K,N), b: (1,N) or None."""
    M, K = x2d.shape
    Kw, N = w.shape
    assert K == Kw

    # Tile sizes: v7x-friendly (fits well under the 32 MiB scoped VMEM default).
    tm = _pick_tile(M, tm_cap, 8)
    tn = _pick_tile(N, tn_cap, 128)
    tk = _pick_tile(K, tk_cap, 128)
    grid = (M // tm, N // tn, K // tk)

    x2d = x2d.astype(compute_dtype)
    w = w.astype(compute_dtype)

    in_specs = [
        pl.BlockSpec((tm, tk), lambda i, j, k: (i, k)),
        pl.BlockSpec((tk, tn), lambda i, j, k: (k, j)),
    ]
    args = [x2d, w]
    if b is not None:
        in_specs.append(pl.BlockSpec((1, tn), lambda i, j, k: (0, j)))
        args.append(b)

    cost = pl.CostEstimate(
        flops=int(2 * M * N * K),
        transcendentals=0,
        bytes_accessed=int(x2d.size * x2d.dtype.itemsize
                           + w.size * w.dtype.itemsize
                           + (b.size * b.dtype.itemsize if b is not None else 0)
                           + M * N * 4),
    )

    return pl.pallas_call(
        partial(_linear_kernel, has_bias=b is not None),
        out_shape=jax.ShapeDtypeStruct((M, N), jnp.float32),
        grid_spec=pltpu.PrefetchScalarGridSpec(
            num_scalar_prefetch=0,
            grid=grid,
            in_specs=in_specs,
            out_specs=pl.BlockSpec((tm, tn), lambda i, j, k: (i, j)),
            scratch_shapes=[pltpu.VMEM((tm, tn), jnp.float32)],
        ),
        compiler_params=pltpu.CompilerParams(
            dimension_semantics=("parallel", "parallel", "arbitrary"),
        ),
        cost_estimate=cost,
    )(*args)


# ---------------------------------------------------------------------------
# Flash-style causal multi-head attention, reading packed (B, T, 3*d_out) QKV
# and writing lane-dense (B, T, d_out) context (heads merged in-kernel).
# ---------------------------------------------------------------------------
def _mha_flash_kernel(qrows_ref, kvrows_ref, o_ref, m_scr, l_scr, acc_scr,
                      *, num_heads, head_dim, d_out, tq, tk, scale):
    qi = pl.program_id(1)
    ki = pl.program_id(2)

    @pl.when(ki == 0)
    def _init():
        m_scr[...] = jnp.full_like(m_scr, _NEG_INF)
        l_scr[...] = jnp.zeros_like(l_scr)
        acc_scr[...] = jnp.zeros_like(acc_scr)

    # Causal block skip: kv tile entirely above the diagonal -> no flops/VALU.
    @pl.when(ki * tk <= qi * tq + (tq - 1))
    def _compute():
        row = qi * tq + jax.lax.broadcasted_iota(jnp.int32, (tq, tk), 0)
        col = ki * tk + jax.lax.broadcasted_iota(jnp.int32, (tq, tk), 1)
        causal = row >= col

        for h in range(num_heads):  # static unrolled head loop, one grid step
            q0 = h * head_dim
            k0 = d_out + h * head_dim
            v0 = 2 * d_out + h * head_dim
            # Scale on q (tq, Dh) instead of on the (tq, tk) scores.
            q_h = qrows_ref[0, :, q0:q0 + head_dim] * scale
            k_h = kvrows_ref[0, :, k0:k0 + head_dim]
            v_h = kvrows_ref[0, :, v0:v0 + head_dim]

            # Contract last axes directly (no explicit k.T / XLU transpose).
            s = jax.lax.dot_general(q_h, k_h, (((1,), (1,)), ((), ())),
                                    preferred_element_type=jnp.float32)
            s = jnp.where(causal, s, _NEG_INF)

            m_prev = m_scr[:, h:h + 1]                                  # (tq,1)
            m_new = jnp.maximum(m_prev, jnp.max(s, axis=-1, keepdims=True))
            alpha = jnp.exp(m_prev - m_new)
            p = jnp.exp(s - m_new)                                      # (tq,tk)

            l_scr[:, h:h + 1] = (alpha * l_scr[:, h:h + 1]
                                 + jnp.sum(p, axis=-1, keepdims=True))
            pv = jax.lax.dot_general(p.astype(v_h.dtype), v_h,
                                     (((1,), (0,)), ((), ())),
                                     preferred_element_type=jnp.float32)
            acc_scr[:, q0:q0 + head_dim] = (alpha * acc_scr[:, q0:q0 + head_dim]
                                            + pv)
            m_scr[:, h:h + 1] = m_new

    @pl.when(ki == pl.num_programs(2) - 1)
    def _finalize():
        chunks = []
        for h in range(num_heads):
            inv_l = pl.reciprocal(l_scr[:, h:h + 1], approx=True)  # EUP slot
            chunks.append(acc_scr[:, h * head_dim:(h + 1) * head_dim] * inv_l)
        # Single lane-dense (tq, d_out) store with heads already merged.
        o_ref[0] = jnp.concatenate(chunks, axis=-1).astype(o_ref.dtype)


def pallas_causal_mha(qkv, num_heads, head_dim, *, tq_cap=128, tk_cap=128):
    """qkv: (B, T, 3*H*Dh) packed as in torch .view(B,T,3,H,Dh); returns (B,T,H*Dh)."""
    B, T, three_k = qkv.shape
    d_out = num_heads * head_dim
    assert three_k == 3 * d_out
    # Matches the module literally: softmax(scores / head_dim**-0.5)  == * sqrt(Dh)
    scale = 1.0 / (float(head_dim) ** -0.5)

    tq = _pick_tile(T, tq_cap, 8)
    tk = _pick_tile(T, tk_cap, 8)
    grid = (B, T // tq, T // tk)

    # q-rows and kv-rows slabs come straight from the packed QKV tensor, so no
    # transpose is materialized in HBM between the projection and attention.
    # TODO(synk): when d_out % 128 == 0 the last dim could be blocked into
    # K-wide q/k/v sections to cut the slab DMA traffic further.
    qrows_spec = pl.BlockSpec((1, tq, three_k), lambda b, qi, ki: (b, qi, 0))
    kvrows_spec = pl.BlockSpec((1, tk, three_k), lambda b, qi, ki: (b, ki, 0))
    out_spec = pl.BlockSpec((1, tq, d_out), lambda b, qi, ki: (b, qi, 0))

    kernel = partial(_mha_flash_kernel, num_heads=num_heads, head_dim=head_dim,
                     d_out=d_out, tq=tq, tk=tk, scale=scale)

    cost = pl.CostEstimate(
        flops=int(2 * B * num_heads * T * T * head_dim),          # causal ~ half
        transcendentals=int(B * num_heads * T * T // 2),
        bytes_accessed=int(2 * qkv.size * qkv.dtype.itemsize + B * T * d_out * 4),
    )

    return pl.pallas_call(
        kernel,
        out_shape=jax.ShapeDtypeStruct((B, T, d_out), jnp.float32),
        grid_spec=pltpu.PrefetchScalarGridSpec(
            num_scalar_prefetch=0,
            grid=grid,
            in_specs=[qrows_spec, kvrows_spec],
            out_specs=out_spec,
            scratch_shapes=[
                pltpu.VMEM((tq, num_heads), jnp.float32),   # running max  m
                pltpu.VMEM((tq, num_heads), jnp.float32),   # running sum  l
                pltpu.VMEM((tq, d_out), jnp.float32),       # output accumulator
            ],
        ),
        compiler_params=pltpu.CompilerParams(
            dimension_semantics=("parallel", "parallel", "arbitrary"),
        ),
        cost_estimate=cost,
    )(qkv, qkv)


# ---------------------------------------------------------------------------
# Module wrapper (eval mode; dropout=0.0)
# ---------------------------------------------------------------------------
class MHACombinedQKVPallas:
    """JAX/Pallas port of MultiHeadAttentionCombinedQKV (eval, dropout off)."""

    def __init__(self, d_in, d_out, num_heads, context_length, key,
                 dropout=0.0, qkv_bias=False, compute_dtype=jnp.float32):
        assert d_out % num_heads == 0, "embed_dim is indivisible by num_heads"
        self.num_heads = num_heads
        self.head_dim = d_out // num_heads
        self.d_out = d_out
        self.context_length = context_length
        self.compute_dtype = compute_dtype  # set jnp.bfloat16 on v6e/v7x
        # TODO(synk): nn.Dropout on attention weights (training, dropout>0) is
        # not implemented; this is the eval forward with dropout=0.0.

        k1, k2, k3, k4 = jax.random.split(key, 4)
        bq = 1.0 / math.sqrt(d_in)
        bp = 1.0 / math.sqrt(d_out)
        # Weights stored transposed vs. PyTorch, i.e. (in, out): out = x @ W (+ b)
        self.w_qkv = jax.random.uniform(k1, (d_in, 3 * d_out), jnp.float32, -bq, bq)
        self.b_qkv = (jax.random.uniform(k4, (1, 3 * d_out), jnp.float32, -bq, bq)
                      if qkv_bias else None)
        self.w_proj = jax.random.uniform(k2, (d_out, d_out), jnp.float32, -bp, bp)
        self.b_proj = jax.random.uniform(k3, (1, d_out), jnp.float32, -bp, bp)

    def __call__(self, x):
        B, T, d_in = x.shape
        cd = self.compute_dtype

        # (1) Fused QKV projection (tiled Pallas matmul).
        qkv = pallas_linear(x.reshape(B * T, d_in), self.w_qkv, self.b_qkv,
                            compute_dtype=cd)
        # Keep the packed (B, T, 3*d_out) layout — only free reshapes, no transposes.
        qkv = qkv.reshape(B, T, 3 * self.d_out)

        # (2) Flash-style causal multi-head attention -> (B, T, d_out), heads merged.
        ctx = pallas_causal_mha(qkv.astype(cd), self.num_heads, self.head_dim)

        # (3) Output projection (tiled Pallas matmul + bias).
        out = pallas_linear(ctx.reshape(B * T, self.d_out), self.w_proj,
                            self.b_proj, compute_dtype=cd)
        return out.reshape(B, T, self.d_out)


# ---------------------------------------------------------------------------
def _reference_forward(mha, x):
    """Pure-JAX replica of the PyTorch forward (same scale convention)."""
    B, T, _ = x.shape
    H, Dh, K = mha.num_heads, mha.head_dim, mha.d_out
    qkv = x.reshape(B * T, -1) @ mha.w_qkv
    if mha.b_qkv is not None:
        qkv = qkv + mha.b_qkv
    qkv = qkv.reshape(B, T, 3, H, Dh).transpose(2, 0, 3, 1, 4)
    q, k, v = qkv[0], qkv[1], qkv[2]
    s = jnp.einsum("bhqd,bhkd->bhqk", q, k)
    mask = jnp.triu(jnp.ones((T, T), bool), k=1)
    s = jnp.where(mask, -jnp.inf, s)
    w = jax.nn.softmax(s / (Dh ** -0.5), axis=-1)  # exactly as in the module
    ctx = jnp.einsum("bhqk,bhkd->bhqd", w, v)
    ctx = ctx.transpose(0, 2, 1, 3).reshape(B * T, K)
    return (ctx @ mha.w_proj + mha.b_proj).reshape(B, T, K)


if __name__ == "__main__":
    # Small shapes consistent with the module's forward.
    batch_size = 2
    num_tokens = 8
    d_in = 32
    d_out = 32
    num_heads = 4
    context_length = num_tokens

    key = jax.random.PRNGKey(0)
    k_params, k_x = jax.random.split(key)

    mha = MHACombinedQKVPallas(d_in, d_out, num_heads, context_length, k_params)
    x = jax.random.normal(k_x, (batch_size, num_tokens, d_in), jnp.float32)

    out = jax.block_until_ready(mha(x))
    ref = _reference_forward(mha, x)

    assert out.shape == (batch_size, num_tokens, d_out)
    assert jnp.allclose(out, ref, atol=2e-3, rtol=2e-3), \
        float(jnp.max(jnp.abs(out - ref)))

    print("KERNEL_OK")
</pallas_src>

<mosaic_0001>
module attributes {stable_mosaic.version = 11 : i64} {
  func.func @_linear_kernel(%arg0: i32, %arg1: i32, %arg2: i32, %arg3: memref<16x32xf32, #tpu.memory_space<vmem>>, %arg4: memref<32x96xf32, #tpu.memory_space<vmem>>, %arg5: memref<16x96xf32, #tpu.memory_space<vmem>>, %arg6: memref<16x96xf32, #tpu.memory_space<vmem>>) attributes {dimension_semantics = [#tpu.dimension_semantics<parallel>, #tpu.dimension_semantics<parallel>, #tpu.dimension_semantics<arbitrary>], iteration_bounds = array<i64: 1, 1, 1>, scalar_prefetch = 0 : i64, scratch_operands = 1 : i64, tpu.core_type = #tpu.core_type<tc>, window_params = [{transform_indices = @transform_0, window_bounds = array<i64: 16, 32>}, {transform_indices = @transform_1, window_bounds = array<i64: 32, 96>}, {transform_indices = @transform_2, window_bounds = array<i64: 16, 96>}]} {
    %c0_i32 = arith.constant 0 : i32
    %0 = arith.cmpi eq, %arg2, %c0_i32 : i32
    %1 = arith.extui %0 : i1 to i32
    %c0_i32_0 = arith.constant 0 : i32
    %2 = arith.cmpi ne, %1, %c0_i32_0 : i32
    scf.if %2 {
      %cst_10 = arith.constant 0.000000e+00 : f32
      %12 = vector.broadcast %cst_10 : f32 to vector<16x96xf32>
      %c0_11 = arith.constant 0 : index
      %c0_12 = arith.constant 0 : index
      %13 = vector.load %arg6[%c0_11, %c0_12] : memref<16x96xf32, #tpu.memory_space<vmem>>, vector<16x96xf32>
      tpu.vector_store %arg6[%c0_11, %c0_12], %12 {strides = array<i32>} : memref<16x96xf32, #tpu.memory_space<vmem>>, vector<16x96xf32>,
    } else {
    }
    %c0 = arith.constant 0 : index
    %c0_1 = arith.constant 0 : index
    %3 = vector.load %arg6[%c0, %c0_1] : memref<16x96xf32, #tpu.memory_space<vmem>>, vector<16x96xf32>
    %c0_2 = arith.constant 0 : index
    %c0_3 = arith.constant 0 : index
    %4 = vector.load %arg3[%c0_2, %c0_3] : memref<16x32xf32, #tpu.memory_space<vmem>>, vector<16x32xf32>
    %c0_4 = arith.constant 0 : index
    %c0_5 = arith.constant 0 : index
    %5 = vector.load %arg4[%c0_4, %c0_5] : memref<32x96xf32, #tpu.memory_space<vmem>>, vector<32x96xf32>
    %cst = arith.constant dense<0.000000e+00> : vector<16x96xf32>
    %6 = tpu.matmul %4, %5, %cst {dimension_numbers = #tpu.dot_dimension_numbers<[1], [0], [0], [1], [0, 0, 1, 1], [], []>} : vector<16x32xf32>, vector<32x96xf32>, vector<16x96xf32> -> vector<16x96xf32>
    %7 = arith.addf %3, %6 : vector<16x96xf32>
    %c0_6 = arith.constant 0 : index
    %c0_7 = arith.constant 0 : index
    %8 = vector.load %arg6[%c0_6, %c0_7] : memref<16x96xf32, #tpu.memory_space<vmem>>, vector<16x96xf32>
    tpu.vector_store %arg6[%c0_6, %c0_7], %7 {strides = array<i32>} : memref<16x96xf32, #tpu.memory_space<vmem>>, vector<16x96xf32>,
    %c0_i32_8 = arith.constant 0 : i32
    %9 = arith.cmpi eq, %arg2, %c0_i32_8 : i32
    %10 = arith.extui %9 : i1 to i32
    %c0_i32_9 = arith.constant 0 : i32
    %11 = arith.cmpi ne, %10, %c0_i32_9 : i32
    scf.if %11 {
      %c0_10 = arith.constant 0 : index
      %c0_11 = arith.constant 0 : index
      %12 = vector.load %arg6[%c0_10, %c0_11] : memref<16x96xf32, #tpu.memory_space<vmem>>, vector<16x96xf32>
      %c0_12 = arith.constant 0 : index
      %c0_13 = arith.constant 0 : index
      %13 = vector.load %arg5[%c0_12, %c0_13] : memref<16x96xf32, #tpu.memory_space<vmem>>, vector<16x96xf32>
      tpu.vector_store %arg5[%c0_12, %c0_13], %12 {strides = array<i32>} : memref<16x96xf32, #tpu.memory_space<vmem>>, vector<16x96xf32>,
    } else {
    }
    return
  }
  func.func @transform_0(%arg0: i32, %arg1: i32, %arg2: i32) -> (i32, i32) {
    %c0_i32 = arith.constant 0 : i32
    return %arg0, %arg2 : i32, i32
  }
  func.func @transform_1(%arg0: i32, %arg1: i32, %arg2: i32) -> (i32, i32) {
    %c0_i32 = arith.constant 0 : i32
    return %arg2, %arg1 : i32, i32
  }
  func.func @transform_2(%arg0: i32, %arg1: i32, %arg2: i32) -> (i32, i32) {
    %c0_i32 = arith.constant 0 : i32
    return %arg0, %arg1 : i32, i32
  }
}

</mosaic_0001>

<bundles_post_ra>
// kernel: tpu_custom_call.1
= control target key start
LH: loop header
LB: loop body
LE: loop exit
PB: predicated region body
PF: predicated region fallthrough
CT: control target
= control target key end

     0   :  { %7 = vsyncpa [#allocation4], 0  ;;  %s305_s0 = inlined_call_operand.hbm [shape: f32[16,32], index: 0, kind: input, shape index: {}]   ;;  %s306_s1 = inlined_call_operand.hbm [shape: f32[32,96], index: 1, kind: input, shape index: {}]   ;;  %s307_s2 = inlined_call_operand.hbm [shape: f32[16,96], index: 2, kind: output, shape index: {}]  }
   0x1   :  { %8 = vsyncpa [#allocation7], 0 }
   0x2   :  { %9 = vsyncpa [#allocation5], 0  ;;  %s258_s9 = smov [#allocation3]  }
   0x3   :  { %s15_s10 = sshll.u32 %s258_s9, 4  ;;  %s16_s10 = int_to_ptr.vmem [resolvable:$true] %s15_s10 }
   0x4   :  { %s200_s11 = scalar_lea.vmem %s16_s10, 256  ;;  %p205_p1 = scmp.lt.s32.totalorder %s16_s10, %s16_s10 }
   0x5   :  { %p201_p0 = scmp.ne.s32.totalorder %s16_s10, %s200_s11  ;;  %p206_p2 = scmp.lt.s32.totalorder %s200_s11, %s200_s11 }
   0x7   :  { %p207_p3 = por %p206_p2, %p205_p1 }
   0x9   :  { %p208_p4 = pnand %p207_p3, %p201_p0 }
   0xb   :  { %211 = shalt.err (!%p208_p4)
}
   0xc   :  { %s259_s12 = smov 128   ;;  %s260_s13 = smov 8  }
   0xd   :  { %21 = dma.hbm_to_vmem [thread:$0]  %s305_s0, 256, %s16_s10, [#allocation4], %s259_s12, %s259_s12, %s260_s13  }
   0xe   :  { %s261_s16 = smov [#allocation6]  }
   0xf   :  { %s27_s17 = sshll.u32 %s261_s16, 4  ;;  %s28_s17 = int_to_ptr.vmem [resolvable:$true] %s27_s17 }
  0x10   :  { %s220_s18 = scalar_lea.vmem %s28_s17, 512  ;;  %p225_p6 = scmp.lt.s32.totalorder %s28_s17, %s28_s17 }
  0x11   :  { %p221_p5 = scmp.ne.s32.totalorder %s28_s17, %s220_s18  ;;  %p226_p7 = scmp.lt.s32.totalorder %s220_s18, %s220_s18 }
  0x13   :  { %p227_p8 = por %p226_p7, %p225_p6 }
  0x15   :  { %p228_p9 = pnand %p227_p8, %p221_p5 }
  0x17   :  { %231 = shalt.err (!%p228_p9)
}
  0x18   :  { %33 = dma.hbm_to_vmem [thread:$0]  %s306_s1, 512, %s28_s17, [#allocation7], %s259_s12, %s259_s12, %s260_s13  }
  0x19   :  { %252 = dma.done.wait [#allocation4], 256  }
  0x1a   :  { %253 = vsyncadd [#allocation4], 4294967040 }
  0x1b   :  { %254 = dma.done.wait [#allocation7], 512  }
  0x1c   :  { %255 = vsyncadd [#allocation7], 4294966784  ;;  %vm44_vm0 = vcmask 785408   ;;  %v262_v0 = vmov 0.0   ;;  %vm55_vm1 = vcmask 261120   ;;  %v54_v1 = vld [vmem:[#allocation6 + $0x18] sm:$0xff] }
  0x1d   :  { %46 = vst.msk [vmem:[#allocation2 + $0x8] sm:$0xff] %vm44_vm0, %v262_v0  ;;  %45 = vst.msk [vmem:[#allocation2] sm:$0xff] %vm44_vm0, %v262_v0  ;;  %v53_v2 = vld [vmem:[#allocation6 + $0x10] sm:$0xff]  ;;  %175 = vmatprep.subr.mxu0 %v54_v1  ;;  %v52_v4 = vld [vmem:[#allocation6 + $0x8] sm:$0xff]  ;;  %s263_s0 = smov [#allocation8]  }
  0x1e   :  { %v49_v3 = vld [vmem:[#allocation3] sm:$0xff]  ;;  %176 = vmatpush3.msra.mxu0 %v54_v1  ;;  %v51_v5 = vld [vmem:[#allocation6] sm:$0xff]  ;;  %v50_v6 = vld [vmem:[#allocation3 + $0x8] sm:$0xff]  ;;  %s154_s1 = sshll.u32 %s263_s0, 4  ;;  %s155_s1 = int_to_ptr.vmem [resolvable:$true] %s154_s1 }
  0x1f   :  { %183 = vmatprep.mubr.msk.f32.mxu0 %vm55_vm1, %v49_v3  ;;  %177 = vmatprep.subr.mxu0 %v53_v2  ;;  %s232_s21 = scalar_lea.vmem %s155_s1, 256  ;;  %p237_p11 = scmp.lt.s32.totalorder %s155_s1, %s155_s1 }
  0x20   :  { %178 = vmatpush3.msra.mxu0 %v53_v2  ;;  %p233_p10 = scmp.ne.s32.totalorder %s155_s1, %s232_s21  ;;  %p238_p12 = scmp.lt.s32.totalorder %s232_s21, %s232_s21 }
  0x21   :  { %179 = vmatprep.subr.mxu0 %v52_v4 }
  0x22   :  { %180 = vmatpush3.msra.mxu0 %v52_v4  ;;  %p239_p13 = por %p238_p12, %p237_p11 }
  0x23   :  { %181 = vmatprep.subr.mxu0 %v51_v5 }
  0x24   :  { %182 = vmatpush3.msra.mxu0 %v51_v5  ;;  %v48_v7 = vld [vmem:[#allocation2 + $0x8] sm:$0xff]  ;;  %v47_v9 = vld [vmem:[#allocation2] sm:$0xff]  ;;  %p240_p0 = pnand %p239_p13, %p233_p10 }
  0x25   :  { %184 = vmatmul.mubr.msk.f32.vlgmr.msra.gmra.mxu0 %vm55_vm1, %v50_v6 }
  0xe5   :  { %v185_v8 = vpop.f32.mrf.mxu0 }
  0xe6   :  { %v138_v10 = vadd.f32 %v185_v8, %v48_v7 }
  0xe7   :  { %v128_v11 = vpop.f32.mrf.mxu0 }
  0xe8   :  { %141 = vst.msk [vmem:[#allocation2 + $0x8] sm:$0xff] %vm44_vm0, %v138_v10  ;;  %v137_v12 = vadd.f32 %v128_v11, %v47_v9 }
  0xea   :  { %140 = vst.msk [vmem:[#allocation2] sm:$0xff] %vm44_vm0, %v137_v12 }
  0xef   :  { %v146_v13 = vld [vmem:[#allocation2 + $0x8] sm:$0xff] }
  0xf0   :  { %148 = vst.msk [vmem:[#allocation8 + $0x8] sm:$0xff] %vm44_vm0, %v146_v13 }
  0xf1   :  { %v145_v14 = vld [vmem:[#allocation2] sm:$0xff] }
  0xf2   :  { %147 = vst.msk [vmem:[#allocation8] sm:$0xff] %vm44_vm0, %v145_v14 }
  0xf3   :  { %243 = shalt.err (!%p240_p0)
}
  0xf4   :  { %160 = dma.vmem_to_hbm [thread:$0]  %s155_s1, 256, %s307_s2, [#allocation5], %s259_s12, %s259_s12, %s260_s13  }
  0xf5   :  { %256 = dma.done.wait [#allocation5], 256  }
  0xf6   :  { %257 = vsyncadd [#allocation5], 4294967040 }
  0xf7   :  { %164 = vsyncpa [#allocation4], 1 }
  0xf8   :  { %165 = vsyncpa [#allocation7], 1 }
  0xf9   :  { %166 = vsyncpa [#allocation5], 1 }

</bundles_post_ra>
